<compile_context>
chip_gen: v7x
topology: tpu7x:2x2x1
jax: 0.10.0
libtpu: 0.0.40
codegen_flags: <defaults>
</compile_context>

<pallas_src>
import functools

import jax
import jax.numpy as jnp
from jax.experimental import pallas as pl
from jax.experimental.pallas import tpu as pltpu


def _rmsnorm_kernel(x_ref, w_ref, o_ref, *, eps):
    # x_ref: (tm, H) row tile; w_ref: (1, H) resident weight row; o_ref: (tm, H).
    xf = x_ref[...].astype(jnp.float32)
    var = jnp.mean(xf * xf, axis=-1, keepdims=True)          # (tm, 1) XLU reduce
    inv = jax.lax.rsqrt(var + eps)                            # EUP rsqrt
    # Re-read + re-upcast the resident input block for the normalize pass so a
    # full tile-sized f32 temp need not stay live across the reduction.
    normed = (x_ref[...].astype(jnp.float32) * inv).astype(x_ref.dtype)
    # Llama casting mode: scale by weight in the weight's (promoted) dtype,
    # then store in the input dtype.
    o_ref[...] = (normed * w_ref[...]).astype(o_ref.dtype)


def _round_up(a, b):
    return ((a + b - 1) // b) * b


def _vmem_limit_bytes():
    """Scoped-VMEM limit to request: ~3/4 of physical, capped at 100 MiB."""
    try:
        cap = int(pltpu.get_tpu_info().vmem_capacity_bytes)
    except Exception:  # fall back to the most conservative generation (v7x)
        cap = 64 * 1024 * 1024
    return min(int(cap * 0.75), 100 * 1024 * 1024)


def _pick_row_tile(rows, hidden, in_dtype, out_dtype, vmem_limit):
    """Pick the row-tile size tm for the (tm, hidden) block."""
    in_b = jnp.dtype(in_dtype).itemsize
    out_b = jnp.dtype(out_dtype).itemsize
    # Sublane pack factor: 8 for f32, 16 for bf16, 32 for int8/fp8.
    pack = max(8, 32 // max(in_b, 1))

    # Per-row VMEM cost: double-buffered input + double-buffered output blocks
    # plus ~1 f32 working temp.  Single margin only (already in vmem_limit).
    per_row = hidden * (2 * in_b + 2 * out_b + 4)
    tm_cap = max(pack, (vmem_limit // per_row // pack) * pack)
    tm_cap = min(tm_cap, 1024)                     # diminishing returns past ~1K rows

    # Pipeline / megacore awareness: aim for >= 8 grid steps (>= 4 per core on
    # v7x, streamed DMA/compute overlap on v5e/v6e), but never shrink the tile
    # below ~512 rows (the HBM-roofline knee) just to get more steps.
    tm_steps = _round_up(max(1, pl.cdiv(rows, 8)), pack)
    tm_floor = min(512, _round_up(rows, pack))
    tm = min(tm_cap, max(tm_steps, tm_floor))
    tm = min(tm, _round_up(rows, pack))
    return max(tm, pack)


def liger_rms_norm(hidden_states, weight, eps=1e-6, row_block=None):
    """RMSNorm forward matching LigerRMSNorm (llama casting mode).

    hidden_states: (..., hidden)
    weight:        (hidden,)
    """
    orig_shape = hidden_states.shape
    hidden = orig_shape[-1]
    x2d = hidden_states.reshape(-1, hidden)
    rows = x2d.shape[0]

    out_dtype = hidden_states.dtype
    vmem_limit = _vmem_limit_bytes()
    tm = row_block if row_block is not None else _pick_row_tile(
        rows, hidden, x2d.dtype, out_dtype, vmem_limit)

    w2d = weight.reshape(1, hidden)

    # Grid covers rows with a (possibly partial) final block; Pallas masks the
    # out-of-bounds writes and per-row math keeps padded reads harmless.
    grid = (pl.cdiv(rows, tm),)

    out = pl.pallas_call(
        functools.partial(_rmsnorm_kernel, eps=eps),
        out_shape=jax.ShapeDtypeStruct((rows, hidden), out_dtype),
        grid_spec=pltpu.PrefetchScalarGridSpec(
            num_scalar_prefetch=0,
            grid=grid,
            in_specs=[
                pl.BlockSpec((tm, hidden), lambda i: (i, 0)),
                pl.BlockSpec((1, hidden), lambda i: (0, 0)),   # resident weight
            ],
            out_specs=pl.BlockSpec((tm, hidden), lambda i: (i, 0)),
        ),
        compiler_params=pltpu.CompilerParams(
            dimension_semantics=("parallel",),
            vmem_limit_bytes=vmem_limit,
        ),
    )(x2d, w2d)

    return out.reshape(orig_shape)


def _reference(x, weight, eps):
    xf = x.astype(jnp.float32)
    var = jnp.mean(xf * xf, axis=-1, keepdims=True)
    normed = (xf * jax.lax.rsqrt(var + eps)).astype(x.dtype)
    return (normed * weight).astype(x.dtype)


if __name__ == "__main__":
    eps = 1e-6
    key = jax.random.PRNGKey(0)

    # Small shape consistent with the module: (batch, seq, hidden).
    batch, seq, hidden = 2, 8, 32
    k0, k1 = jax.random.split(key)
    x = jax.random.normal(k0, (batch, seq, hidden), dtype=jnp.float32)
    weight = jnp.ones((hidden,), dtype=jnp.float32)   # nn.Parameter(torch.ones(H))

    y = liger_rms_norm(x, weight, eps)
    jax.block_until_ready(y)
    ref = _reference(x, weight, eps)
    assert y.shape == x.shape and y.dtype == x.dtype
    assert jnp.allclose(y, ref, atol=1e-5, rtol=1e-5)

    # Exercise the non-divisible (partial final block) path with a forced
    # small row tile: rows = 3*5 = 15, tm = 8 -> grid of 2 with a masked tail.
    x2 = jax.random.normal(k1, (3, 5, 256), dtype=jnp.float32)
    w2 = jnp.ones((256,), dtype=jnp.float32)
    y2 = liger_rms_norm(x2, w2, eps, row_block=8)
    jax.block_until_ready(y2)
    ref2 = _reference(x2, w2, eps)
    assert jnp.allclose(y2, ref2, atol=1e-5, rtol=1e-5)

    print("KERNEL_OK")
</pallas_src>

<mosaic_0001>
module attributes {stable_mosaic.version = 11 : i64} {
  func.func @_rmsnorm_kernel(%arg0: i32, %arg1: memref<16x32xf32, #tpu.memory_space<vmem>>, %arg2: memref<1x32xf32, #tpu.memory_space<vmem>>, %arg3: memref<16x32xf32, #tpu.memory_space<vmem>>) attributes {dimension_semantics = [#tpu.dimension_semantics<parallel>], iteration_bounds = array<i64: 1>, scalar_prefetch = 0 : i64, scratch_operands = 0 : i64, tpu.core_type = #tpu.core_type<tc>, window_params = [{transform_indices = @transform_0, window_bounds = array<i64: 16, 32>}, {pipeline_mode = #tpu.pipeline_mode<synchronous>, transform_indices = @transform_1, window_bounds = array<i64: 1, 32>}, {transform_indices = @transform_2, window_bounds = array<i64: 16, 32>}]} {
    %c0 = arith.constant 0 : index
    %c0_0 = arith.constant 0 : index
    %0 = vector.load %arg1[%c0, %c0_0] : memref<16x32xf32, #tpu.memory_space<vmem>>, vector<16x32xf32>
    %1 = arith.mulf %0, %0 : vector<16x32xf32>
    %cst = arith.constant dense<0.000000e+00> : vector<16xf32>
    %2 = vector.multi_reduction <add>, %1, %cst [1] : vector<16x32xf32> to vector<16xf32>
    %3 = vector.shape_cast %2 : vector<16xf32> to vector<16x1xf32>
    %cst_1 = arith.constant 3.200000e+01 : f32
    %4 = vector.broadcast %cst_1 : f32 to vector<16x1xf32>
    %5 = arith.divf %3, %4 : vector<16x1xf32>
    %cst_2 = arith.constant 9.99999997E-7 : f32
    %6 = vector.broadcast %cst_2 : f32 to vector<16x1xf32>
    %7 = arith.addf %5, %6 : vector<16x1xf32>
    %8 = math.rsqrt %7 : vector<16x1xf32>
    %c0_3 = arith.constant 0 : index
    %c0_4 = arith.constant 0 : index
    %9 = vector.load %arg1[%c0_3, %c0_4] : memref<16x32xf32, #tpu.memory_space<vmem>>, vector<16x32xf32>
    %10 = vector.broadcast %8 : vector<16x1xf32> to vector<16x32xf32>
    %11 = arith.mulf %9, %10 : vector<16x32xf32>
    %c0_5 = arith.constant 0 : index
    %c0_6 = arith.constant 0 : index
    %12 = vector.load %arg2[%c0_5, %c0_6] : memref<1x32xf32, #tpu.memory_space<vmem>>, vector<1x32xf32>
    %13 = vector.broadcast %12 : vector<1x32xf32> to vector<16x32xf32>
    %14 = arith.mulf %11, %13 : vector<16x32xf32>
    %c0_7 = arith.constant 0 : index
    %c0_8 = arith.constant 0 : index
    %15 = vector.load %arg3[%c0_7, %c0_8] : memref<16x32xf32, #tpu.memory_space<vmem>>, vector<16x32xf32>
    tpu.vector_store %arg3[%c0_7, %c0_8], %14 {strides = array<i32>} : memref<16x32xf32, #tpu.memory_space<vmem>>, vector<16x32xf32>,
    return
  }
  func.func @transform_0(%arg0: i32) -> (i32, i32) {
    %c0_i32 = arith.constant 0 : i32
    %c0_i32_0 = arith.constant 0 : i32
    return %arg0, %c0_i32 : i32, i32
  }
  func.func @transform_1(%arg0: i32) -> (i32, i32) {
    %c0_i32 = arith.constant 0 : i32
    %c0_i32_0 = arith.constant 0 : i32
    %c0_i32_1 = arith.constant 0 : i32
    return %c0_i32, %c0_i32_0 : i32, i32
  }
  func.func @transform_2(%arg0: i32) -> (i32, i32) {
    %c0_i32 = arith.constant 0 : i32
    %c0_i32_0 = arith.constant 0 : i32
    return %arg0, %c0_i32 : i32, i32
  }
}

</mosaic_0001>

<bundles_post_ra>
// kernel: tpu_custom_call.1
= control target key start
LH: loop header
LB: loop body
LE: loop exit
PB: predicated region body
PF: predicated region fallthrough
CT: control target
= control target key end

     0   :  { %7 = vsyncpa [#allocation3], 0  ;;  %s187_s0 = inlined_call_operand.hbm [shape: f32[16,32], index: 0, kind: input, shape index: {}]   ;;  %s188_s1 = inlined_call_operand.vmem [shape: f32[1,32], index: 1, kind: input, shape index: {}]   ;;  %s189_s2 = inlined_call_operand.hbm [shape: f32[16,32], index: 2, kind: output, shape index: {}]  }
   0x1   :  { %8 = vsyncpa [#allocation4], 0  ;;  %s131_s9 = smov [#allocation2]   ;;  %s83_s13 = scalar_lea.hbm %s187_s0, 256 }
   0x2   :  { %s14_s10 = sshll.u32 %s131_s9, 4  ;;  %p84_p0 = scmp.ne.s32.totalorder %s187_s0, %s83_s13  ;;  %s15_s10 = int_to_ptr.vmem [resolvable:$true] %s14_s10 }
   0x3   :  { %p87_p1 = scmp.lt.u32.totalorder %s83_s13, %s187_s0 }
   0x5   :  { %p89_p2 = pnand %p87_p1, %p84_p0 }
   0x7   :  { %92 = shalt.err (!%p89_p2)
}
   0x8   :  { %s93_s18 = scalar_lea.vmem %s15_s10, 256  ;;  %p98_p4 = scmp.lt.s32.totalorder %s15_s10, %s15_s10 }
   0x9   :  { %p94_p3 = scmp.ne.s32.totalorder %s15_s10, %s93_s18  ;;  %p99_p5 = scmp.lt.s32.totalorder %s93_s18, %s93_s18 }
   0xb   :  { %p100_p6 = por %p99_p5, %p98_p4 }
   0xd   :  { %p101_p7 = pnand %p100_p6, %p94_p3 }
   0xf   :  { %104 = shalt.err (!%p101_p7)
}
  0x10   :  { %s132_s19 = smov 128   ;;  %s133_s20 = smov 8  }
  0x11   :  { %20 = dma.hbm_to_vmem [thread:$0]  %s187_s0, 256, %s15_s10, [#allocation3], %s132_s19, %s132_s19, %s133_s20  }
  0x12   :  { %127 = dma.done.wait [#allocation3], 256  }
  0x13   :  { %128 = vsyncadd [#allocation3], 4294967040  ;;  %v26_v0 = vld [vmem:[#allocation2] sm:$0xff]  ;;  %vm30_vm0 = vcmask 261120   ;;  %v27_v1 = vld [vmem:[#allocation2 + $0x8] sm:$0xff]  ;;  %s134_s24 = smov [#allocation5]  }
  0x14   :  { %v28_v2 = vmul.f32 %v26_v0, %v26_v0  ;;  %v29_v3 = vmul.f32 %v27_v1, %v27_v1  ;;  %v74_v13 = vld [vmem:[%s188_s1] ss:$0 sm:$0xff]  ;;  %s62_s25 = sshll.u32 %s134_s24, 4  ;;  %s63_s25 = int_to_ptr.vmem [resolvable:$true] %s62_s25 }
  0x15   :  { %s105_s26 = scalar_lea.vmem %s63_s25, 256  ;;  %p110_p9 = scmp.lt.s32.totalorder %s63_s25, %s63_s25 }
  0x16   :  { %v31_v4 = vsel %vm30_vm0, %v28_v2, 0.0  ;;  %v34_v5 = vsel %vm30_vm0, %v29_v3, 0.0  ;;  %p106_p8 = scmp.ne.s32.totalorder %s63_s25, %s105_s26  ;;  %p111_p10 = scmp.lt.s32.totalorder %s105_s26, %s105_s26 }
  0x17   :  { %32 = vadd.xlane.f32.xlu0 %v31_v4 }
  0x18   :  { %p112_p11 = por %p111_p10, %p110_p9 }
  0x1a   :  { %p113_p12 = pnand %p112_p11, %p106_p8 }
  0x1b   :  { %35 = vadd.xlane.f32.xlu0 %v34_v5 }
  0xa4   :  { %v33_v6 = vpop.xlane.xlu0 %32 }
  0xa5   :  { %v38_v7 = vmul.f32 0.03125, %v33_v6 }
  0xa7   :  { %v40_v8 = vadd.f32 1e-06, %v38_v7 }
  0xa8   :  { %v36_v9 = vpop.xlane.xlu0 %35 }
  0xa9   :  { %79 = vrsqrt.f32 %v40_v8  ;;  %v39_v10 = vmul.f32 0.03125, %v36_v9 }
  0xab   :  { %v41_v11 = vadd.f32 1e-06, %v39_v10 }
  0xad   :  { %81 = vrsqrt.f32 %v41_v11 }
  0xb3   :  { %v80_v12 = vpop.eup %79 }
  0xb4   :  { %v44_v14 = vmul.f32 %v80_v12, %v26_v0 }
  0xb6   :  { %v53_v15 = vmul.f32 %v74_v13, %v44_v14 }
  0xb7   :  { %v82_v16 = vpop.eup %81 }
  0xb8   :  { %v45_v17 = vmul.f32 %v82_v16, %v27_v1  ;;  %55 = vst.msk [vmem:[#allocation5] sm:$0xff] %vm30_vm0, %v53_v15 }
  0xba   :  { %v54_v18 = vmul.f32 %v74_v13, %v45_v17 }
  0xbc   :  { %56 = vst.msk [vmem:[#allocation5 + $0x8] sm:$0xff] %vm30_vm0, %v54_v18 }
  0xbd   :  { %116 = shalt.err (!%p113_p12)
}
  0xbe   :  { %s117_s28 = scalar_lea.hbm %s189_s2, 256 }
  0xbf   :  { %p118_p13 = scmp.ne.s32.totalorder %s189_s2, %s117_s28  ;;  %p121_p0 = scmp.lt.u32.totalorder %s117_s28, %s189_s2 }
  0xc1   :  { %p123_p1 = pnand %p121_p0, %p118_p13 }
  0xc3   :  { %126 = shalt.err (!%p123_p1)
}
  0xc4   :  { %68 = dma.vmem_to_hbm [thread:$0]  %s63_s25, 256, %s189_s2, [#allocation4], %s132_s19, %s132_s19, %s133_s20  }
  0xc5   :  { %129 = dma.done.wait [#allocation4], 256  }
  0xc6   :  { %130 = vsyncadd [#allocation4], 4294967040 }
  0xc7   :  { %72 = vsyncpa [#allocation3], 1 }
  0xc8   :  { %73 = vsyncpa [#allocation4], 1 }

</bundles_post_ra>
